<compile_context>
chip_gen: v7x
topology: tpu7x:2x2x1
jax: 0.10.0
libtpu: 0.0.40
codegen_flags: <defaults>
</compile_context>

<pallas_src>
import jax
import jax.numpy as jnp
from jax.experimental import pallas as pl
from jax.experimental.pallas import tpu as pltpu

H1, H2 = 128, 256  # hidden sizes of the Critic MLP


def _round_up(x, m):
    return ((x + m - 1) // m) * m


def critic_kernel(x_ref, w1_ref, b1_ref, w2_ref, b2_ref, w3_ref, b3_ref, out_ref):
    # Layer 1: Linear(lm -> 128) + ReLU.  Cast the states tile to bf16 on the
    # VPU (hidden under the DMA of the next tile); f32 accumulation on the MXU.
    x = x_ref[...].astype(w1_ref.dtype)
    h1 = jnp.dot(x, w1_ref[...], preferred_element_type=jnp.float32)
    h1 = jnp.maximum(h1 + b1_ref[...], 0.0)
    # Layer 2: Linear(128 -> 256) + ReLU, kept in f32 (MXU slack, no pack pass).
    h2 = jnp.dot(h1, w2_ref[...], preferred_element_type=jnp.float32)
    h2 = jnp.maximum(h2 + b2_ref[...], 0.0)
    # Layer 3: Linear(256 -> 1), natural MXU orientation -> (tb, 1) column.
    v = jnp.dot(h2, w3_ref[...], preferred_element_type=jnp.float32)
    out_ref[...] = (v + b3_ref[0]).astype(out_ref.dtype)


def _choose_batch_tile(B, lm, in_itemsize, target_tile_bytes, vmem_budget_bytes):
    """Pick the batch tile by bytes, multiple of 128, within a VMEM budget."""
    # Weights/biases kept VMEM-resident; count them twice in case the compiler
    # double-buffers the constant-index blocks.
    fixed = 2 * (lm * H1 * 2 + H1 * 4 + H1 * H2 * 4 + H2 * 4 + H2 * 4)
    # Per batch row: double-buffered input row + f32 h1/h2 intermediates +
    # double-buffered output element.
    per_row = 2 * lm * in_itemsize + (H1 + H2) * 4 + 2 * 4
    avail = max(vmem_budget_bytes - fixed - (2 << 20), per_row * 128)
    tb = min(max(target_tile_bytes // max(lm * in_itemsize, 1), 128),
             avail // per_row)
    tb = max(128, (tb // 128) * 128)        # multiple of 128 (full-lane tiles)
    tb = min(tb, _round_up(B, 128))         # never larger than the batch
    est = fixed + per_row * tb + (1 << 20)  # rough per-step VMEM estimate
    return int(tb), int(est)


def critic_forward(states, params, *, target_tile_bytes=2 << 20,
                   vmem_budget_bytes=32 << 20):
    """states: [B, lm_size] -> value: [B, 1] float32."""
    w1, b1, w2, b2, w3, b3 = params
    B, lm = states.shape
    assert w1.shape == (lm, H1) and w2.shape == (H1, H2) and w3.shape[0] == H2

    in_itemsize = jnp.dtype(states.dtype).itemsize
    tb, vmem_est = _choose_batch_tile(B, lm, in_itemsize,
                                      target_tile_bytes, vmem_budget_bytes)
    num_tiles = pl.cdiv(B, tb)

    # Small one-time wrapper-side casts (weights only; states are untouched).
    w1c = w1.astype(jnp.bfloat16)
    b1c = b1.reshape(1, H1).astype(jnp.float32)
    w2c = w2.astype(jnp.float32)
    b2c = b2.reshape(1, H2).astype(jnp.float32)
    w3c = w3.reshape(H2, 1).astype(jnp.float32)
    b3c = b3.reshape(1).astype(jnp.float32)

    cost = pl.CostEstimate(
        flops=2 * B * (lm * H1 + H1 * H2 + H2),
        transcendentals=0,
        bytes_accessed=(B * lm * in_itemsize                   # states (dominant)
                        + lm * H1 * 2 + H1 * H2 * 4 + H2 * 4   # weights
                        + (H1 + H2 + 1) * 4                    # biases
                        + B * 4))                              # output

    # Only raise the scoped-VMEM limit when the estimate approaches the
    # smallest default (16 MiB on v5e); cap well under v7x's 64 MiB physical.
    vmem_limit = None
    if vmem_est > (14 << 20):
        vmem_limit = min(int(vmem_est * 1.25) + (2 << 20), 48 << 20)

    out = pl.pallas_call(
        critic_kernel,
        out_shape=jax.ShapeDtypeStruct((B, 1), jnp.float32),
        grid=(num_tiles,),
        in_specs=[
            pl.BlockSpec((tb, lm), lambda i: (i, 0)),           # states tile
            pl.BlockSpec((lm, H1), lambda i: (0, 0)),           # w1 (resident, bf16)
            pl.BlockSpec((1, H1), lambda i: (0, 0)),            # b1
            pl.BlockSpec((H1, H2), lambda i: (0, 0)),           # w2 (resident, f32)
            pl.BlockSpec((1, H2), lambda i: (0, 0)),            # b2
            pl.BlockSpec((H2, 1), lambda i: (0, 0)),            # w3 column
            pl.BlockSpec(memory_space=pltpu.MemorySpace.SMEM),  # b3 scalar
        ],
        out_specs=pl.BlockSpec((tb, 1), lambda i: (i, 0)),
        compiler_params=pltpu.CompilerParams(
            dimension_semantics=("parallel",),
            vmem_limit_bytes=vmem_limit),
        cost_estimate=cost,
    )(states, w1c, b1c, w2c, b2c, w3c, b3c)
    return out


def init_critic_params(key, lm_size):
    """PyTorch nn.Linear-style init; weights stored as [in, out]."""
    def linear(k, fan_in, fan_out):
        kw, kb = jax.random.split(k)
        bound = 1.0 / (fan_in ** 0.5)
        w = jax.random.uniform(kw, (fan_in, fan_out), jnp.float32, -bound, bound)
        b = jax.random.uniform(kb, (1, fan_out), jnp.float32, -bound, bound)
        return w, b

    k1, k2, k3 = jax.random.split(key, 3)
    w1, b1 = linear(k1, lm_size, H1)
    w2, b2 = linear(k2, H1, H2)
    w3, b3 = linear(k3, H2, 1)
    return (w1, b1, w2, b2, w3, b3)


def critic_reference(states, params, layer1_bf16=True):
    """Pure-JAX reference.  layer1_bf16=True mirrors the kernel's casts."""
    w1, b1, w2, b2, w3, b3 = params
    if layer1_bf16:
        h1 = jnp.dot(states.astype(jnp.bfloat16), w1.astype(jnp.bfloat16),
                     preferred_element_type=jnp.float32)
    else:
        h1 = jnp.dot(states, w1, preferred_element_type=jnp.float32)
    h1 = jnp.maximum(h1 + b1.reshape(1, -1), 0.0)
    h2 = jnp.maximum(jnp.dot(h1, w2, preferred_element_type=jnp.float32)
                     + b2.reshape(1, -1), 0.0)
    return (jnp.dot(h2, w3.reshape(-1, 1), preferred_element_type=jnp.float32)
            + b3.reshape(1, 1))


if __name__ == "__main__":
    key = jax.random.PRNGKey(0)
    k_params, k_x1, k_x2 = jax.random.split(key, 3)

    lm_size = 32
    params = init_critic_params(k_params, lm_size)

    # Small batch: a single (partial / ragged) tile.
    states_small = jax.random.normal(k_x1, (8, lm_size), dtype=jnp.float32)
    value_small = critic_forward(states_small, params)
    jax.block_until_ready(value_small)
    assert value_small.shape == (8, 1)
    ref_small = critic_reference(states_small, params)
    ref_small_f32 = critic_reference(states_small, params, layer1_bf16=False)
    assert jnp.allclose(value_small, ref_small, atol=1e-2, rtol=1e-2)
    assert jnp.allclose(value_small, ref_small_f32, atol=5e-2, rtol=5e-2)

    # Larger, non-divisible batch with a small byte target so the grid has
    # several tiles plus a ragged tail (300 = 2*128 + 44), all without padding.
    states_big = jax.random.normal(k_x2, (300, lm_size), dtype=jnp.float32)
    value_big = critic_forward(states_big, params,
                               target_tile_bytes=128 * lm_size * 4)
    jax.block_until_ready(value_big)
    assert value_big.shape == (300, 1)
    ref_big = critic_reference(states_big, params)
    assert jnp.allclose(value_big, ref_big, atol=1e-2, rtol=1e-2)

    print("KERNEL_OK")
</pallas_src>

<mosaic_0001>
module attributes {stable_mosaic.version = 11 : i64} {
  func.func @critic_kernel(%arg0: i32, %arg1: memref<128x32xf32, #tpu.memory_space<vmem>>, %arg2: memref<32x128xbf16, #tpu.memory_space<vmem>>, %arg3: memref<1x128xf32, #tpu.memory_space<vmem>>, %arg4: memref<128x256xf32, #tpu.memory_space<vmem>>, %arg5: memref<1x256xf32, #tpu.memory_space<vmem>>, %arg6: memref<256x1xf32, #tpu.memory_space<vmem>>, %arg7: memref<1xf32, #tpu.memory_space<smem>>, %arg8: memref<128x1xf32, #tpu.memory_space<vmem>>) attributes {dimension_semantics = [#tpu.dimension_semantics<parallel>], iteration_bounds = array<i64: 1>, scalar_prefetch = 0 : i64, scratch_operands = 0 : i64, tpu.core_type = #tpu.core_type<tc>, window_params = [{transform_indices = @transform_0, window_bounds = array<i64: 128, 32>}, {pipeline_mode = #tpu.pipeline_mode<synchronous>, transform_indices = @transform_1, window_bounds = array<i64: 32, 128>}, {pipeline_mode = #tpu.pipeline_mode<synchronous>, transform_indices = @transform_2, window_bounds = array<i64: 1, 128>}, {pipeline_mode = #tpu.pipeline_mode<synchronous>, transform_indices = @transform_3, window_bounds = array<i64: 128, 256>}, {pipeline_mode = #tpu.pipeline_mode<synchronous>, transform_indices = @transform_4, window_bounds = array<i64: 1, 256>}, {pipeline_mode = #tpu.pipeline_mode<synchronous>, transform_indices = @transform_5, window_bounds = array<i64: 256, 1>}, {transform_indices = @transform_6, window_bounds = array<i64: 1>}, {transform_indices = @transform_7, window_bounds = array<i64: 128, 1>}]} {
    %c0 = arith.constant 0 : index
    %c0_0 = arith.constant 0 : index
    %0 = vector.load %arg1[%c0, %c0_0] : memref<128x32xf32, #tpu.memory_space<vmem>>, vector<128x32xf32>
    %1 = arith.truncf %0 : vector<128x32xf32> to vector<128x32xbf16>
    %c0_1 = arith.constant 0 : index
    %c0_2 = arith.constant 0 : index
    %2 = vector.load %arg2[%c0_1, %c0_2] : memref<32x128xbf16, #tpu.memory_space<vmem>>, vector<32x128xbf16>
    %cst = arith.constant dense<0.000000e+00> : vector<128x128xf32>
    %3 = tpu.matmul %1, %2, %cst {dimension_numbers = #tpu.dot_dimension_numbers<[1], [0], [0], [1], [0, 0, 1, 1], [], []>} : vector<128x32xbf16>, vector<32x128xbf16>, vector<128x128xf32> -> vector<128x128xf32>
    %c0_3 = arith.constant 0 : index
    %c0_4 = arith.constant 0 : index
    %4 = vector.load %arg3[%c0_3, %c0_4] : memref<1x128xf32, #tpu.memory_space<vmem>>, vector<1x128xf32>
    %5 = vector.broadcast %4 : vector<1x128xf32> to vector<128x128xf32>
    %6 = arith.addf %3, %5 : vector<128x128xf32>
    %cst_5 = arith.constant 0.000000e+00 : f32
    %7 = vector.broadcast %cst_5 : f32 to vector<128x128xf32>
    %8 = arith.maximumf %6, %7 : vector<128x128xf32>
    %c0_6 = arith.constant 0 : index
    %c0_7 = arith.constant 0 : index
    %9 = vector.load %arg4[%c0_6, %c0_7] : memref<128x256xf32, #tpu.memory_space<vmem>>, vector<128x256xf32>
    %cst_8 = arith.constant dense<0.000000e+00> : vector<128x256xf32>
    %10 = tpu.matmul %8, %9, %cst_8 {dimension_numbers = #tpu.dot_dimension_numbers<[1], [0], [0], [1], [0, 0, 1, 1], [], []>} : vector<128x128xf32>, vector<128x256xf32>, vector<128x256xf32> -> vector<128x256xf32>
    %c0_9 = arith.constant 0 : index
    %c0_10 = arith.constant 0 : index
    %11 = vector.load %arg5[%c0_9, %c0_10] : memref<1x256xf32, #tpu.memory_space<vmem>>, vector<1x256xf32>
    %12 = vector.broadcast %11 : vector<1x256xf32> to vector<128x256xf32>
    %13 = arith.addf %10, %12 : vector<128x256xf32>
    %cst_11 = arith.constant 0.000000e+00 : f32
    %14 = vector.broadcast %cst_11 : f32 to vector<128x256xf32>
    %15 = arith.maximumf %13, %14 : vector<128x256xf32>
    %c0_12 = arith.constant 0 : index
    %c0_13 = arith.constant 0 : index
    %16 = vector.load %arg6[%c0_12, %c0_13] : memref<256x1xf32, #tpu.memory_space<vmem>>, vector<256x1xf32>
    %cst_14 = arith.constant dense<0.000000e+00> : vector<128x1xf32>
    %17 = tpu.matmul %15, %16, %cst_14 {dimension_numbers = #tpu.dot_dimension_numbers<[1], [0], [0], [1], [0, 0, 1, 1], [], []>} : vector<128x256xf32>, vector<256x1xf32>, vector<128x1xf32> -> vector<128x1xf32>
    %c0_15 = arith.constant 0 : index
    %18 = memref.load %arg7[%c0_15] : memref<1xf32, #tpu.memory_space<smem>>
    %19 = vector.broadcast %18 : f32 to vector<128x1xf32>
    %20 = arith.addf %17, %19 : vector<128x1xf32>
    %c0_16 = arith.constant 0 : index
    %c0_17 = arith.constant 0 : index
    %21 = vector.load %arg8[%c0_16, %c0_17] : memref<128x1xf32, #tpu.memory_space<vmem>>, vector<128x1xf32>
    tpu.vector_store %arg8[%c0_16, %c0_17], %20 {strides = array<i32>} : memref<128x1xf32, #tpu.memory_space<vmem>>, vector<128x1xf32>,
    return
  }
  func.func @transform_0(%arg0: i32) -> (i32, i32) {
    %c0_i32 = arith.constant 0 : i32
    %c0_i32_0 = arith.constant 0 : i32
    return %arg0, %c0_i32 : i32, i32
  }
  func.func @transform_1(%arg0: i32) -> (i32, i32) {
    %c0_i32 = arith.constant 0 : i32
    %c0_i32_0 = arith.constant 0 : i32
    %c0_i32_1 = arith.constant 0 : i32
    return %c0_i32, %c0_i32_0 : i32, i32
  }
  func.func @transform_2(%arg0: i32) -> (i32, i32) {
    %c0_i32 = arith.constant 0 : i32
    %c0_i32_0 = arith.constant 0 : i32
    %c0_i32_1 = arith.constant 0 : i32
    return %c0_i32, %c0_i32_0 : i32, i32
  }
  func.func @transform_3(%arg0: i32) -> (i32, i32) {
    %c0_i32 = arith.constant 0 : i32
    %c0_i32_0 = arith.constant 0 : i32
    %c0_i32_1 = arith.constant 0 : i32
    return %c0_i32, %c0_i32_0 : i32, i32
  }
  func.func @transform_4(%arg0: i32) -> (i32, i32) {
    %c0_i32 = arith.constant 0 : i32
    %c0_i32_0 = arith.constant 0 : i32
    %c0_i32_1 = arith.constant 0 : i32
    return %c0_i32, %c0_i32_0 : i32, i32
  }
  func.func @transform_5(%arg0: i32) -> (i32, i32) {
    %c0_i32 = arith.constant 0 : i32
    %c0_i32_0 = arith.constant 0 : i32
    %c0_i32_1 = arith.constant 0 : i32
    return %c0_i32, %c0_i32_0 : i32, i32
  }
  func.func @transform_6(%arg0: i32) -> i32 {
    %c0_i32 = arith.constant 0 : i32
    %c0_i32_0 = arith.constant 0 : i32
    return %c0_i32 : i32
  }
  func.func @transform_7(%arg0: i32) -> (i32, i32) {
    %c0_i32 = arith.constant 0 : i32
    %c0_i32_0 = arith.constant 0 : i32
    return %arg0, %c0_i32 : i32, i32
  }
}

</mosaic_0001>

<bundles_post_ra>
// kernel: tpu_custom_call.1
= control target key start
LH: loop header
LB: loop body
LE: loop exit
PB: predicated region body
PF: predicated region fallthrough
CT: control target
= control target key end

     0   :  { %13 = vsyncpa [#allocation4], 0  ;;  %s1324_s0 = inlined_call_operand.hbm [shape: f32[8,32], index: 0, kind: input, shape index: {}]   ;;  %s1325_s1 = inlined_call_operand.vmem [shape: bf16[32,128], index: 1, kind: input, shape index: {}]   ;;  %s1326_s2 = inlined_call_operand.hbm [shape: f32[1,128], index: 2, kind: input, shape index: {}]   ;;  %s1327_s3 = inlined_call_operand.vmem [shape: f32[128,256], index: 3, kind: input, shape index: {}]   ;;  %s1328_s4 = inlined_call_operand.vmem [shape: f32[1,256], index: 4, kind: input, shape index: {}]   ;;  %s1329_s5 = inlined_call_operand.vmem [shape: f32[256,1], index: 5, kind: input, shape index: {}]   ;;  %s1330_s6 = inlined_call_operand.<no memory space> [shape: f32[1], index: 6, kind: input, shape index: {}]   ;;  %s1331_s7 = inlined_call_operand.vmem [shape: f32[8,1], index: 7, kind: output, shape index: {}]  }
   0x1   :  { %14 = vsyncpa [#allocation6], 0 }
   0x2   :  { %19 = vsyncadd [#allocation4], 1920  ;;  %s970_s24 = smov [#allocation3]   ;;  %s922_s28 = scalar_lea.hbm %s1324_s0, 128 }
   0x3   :  { %s20_s25 = sshll.u32 %s970_s24, 4  ;;  %p923_p0 = scmp.ne.s32.totalorder %s1324_s0, %s922_s28  ;;  %s21_s25 = int_to_ptr.vmem [resolvable:$true] %s20_s25 }
   0x4   :  { %p926_p1 = scmp.lt.u32.totalorder %s922_s28, %s1324_s0 }
   0x6   :  { %p928_p2 = pnand %p926_p1, %p923_p0 }
   0x8   :  { %931 = shalt.err (!%p928_p2)
}
   0x9   :  { %s932_s10 = scalar_lea.vmem %s21_s25, 128  ;;  %s936_s11 = scalar_lea.vmem %s21_s25, 2048 }
   0xa   :  { %p933_p3 = scmp.ne.s32.totalorder %s21_s25, %s932_s10  ;;  %p937_p4 = scmp.lt.s32.totalorder %s21_s25, %s21_s25 }
   0xb   :  { %p938_p5 = scmp.lt.s32.totalorder %s936_s11, %s932_s10 }
   0xd   :  { %p939_p6 = por %p938_p5, %p937_p4 }
   0xf   :  { %p940_p7 = pnand %p939_p6, %p933_p3 }
  0x11   :  { %943 = shalt.err (!%p940_p7)
}
  0x12   :  { %s971_s12 = smov 128   ;;  %s972_s13 = smov 8  }
  0x13   :  { %26 = dma.hbm_to_vmem [thread:$0]  %s1324_s0, 128, %s21_s25, [#allocation4], %s971_s12, %s971_s12, %s972_s13  }
  0x14   :  { %s973_s16 = smov [#allocation5]   ;;  %s944_s20 = scalar_lea.hbm %s1326_s2, 16 }
  0x15   :  { %s35_s17 = sshll.u32 %s973_s16, 4  ;;  %p945_p8 = scmp.ne.s32.totalorder %s1326_s2, %s944_s20  ;;  %s36_s17 = int_to_ptr.vmem [resolvable:$true] %s35_s17 }
  0x16   :  { %p948_p9 = scmp.lt.u32.totalorder %s944_s20, %s1326_s2 }
  0x18   :  { %p950_p10 = pnand %p948_p9, %p945_p8 }
  0x1a   :  { %953 = shalt.err (!%p950_p10)
}
  0x1b   :  { %s954_s26 = scalar_lea.vmem %s36_s17, 16  ;;  %s958_s0 = scalar_lea.vmem %s36_s17, 32 }
  0x1c   :  { %p955_p11 = scmp.ne.s32.totalorder %s36_s17, %s954_s26  ;;  %p959_p12 = scmp.lt.s32.totalorder %s36_s17, %s36_s17 }
  0x1d   :  { %p960_p13 = scmp.lt.s32.totalorder %s958_s0, %s954_s26 }
  0x1f   :  { %p961_p0 = por %p960_p13, %p959_p12 }
  0x21   :  { %p962_p1 = pnand %p961_p0, %p955_p11 }
  0x23   :  { %965 = shalt.err (!%p962_p1)
}
  0x24   :  { %38 = dma.hbm_to_vmem [thread:$0]  %s1326_s2, 16, %s36_s17, [#allocation6]  }
  0x25   :  { %966 = dma.done.wait [#allocation4], 2048  }
  0x26   :  { %967 = vsyncadd [#allocation4], 4294965248 }
  0x27   :  { %968 = dma.done.wait [#allocation6], 16  }
  0x28   :  { %969 = vsyncadd [#allocation6], 4294967280  ;;  %v920_v0 = vld [vmem:[%s1325_s1] sm:$0xff]   ;;  %v921_v1 = vld [vmem:[%s1325_s1 + $0x8] sm:$0xff]   ;;  %vm101_vm0 = vcmask 261120   ;;  %vm655_vm1 = vcmask 7168  }
  0x29   :  { %815 = vmatprep.subr.bf16.mxu0 %v920_v0  ;;  %v54_v2 = vld [vmem:[#allocation3] sm:$0xff]  ;;  %v55_v3 = vld [vmem:[#allocation3 + $0x8] sm:$0xff]  ;;  %v56_v5 = vld [vmem:[#allocation3 + $0x10] sm:$0xff] }
  0x2a   :  { %816 = vmatpush3.bf16.msra.mxu0 %v920_v0  ;;  %v70_v4 = vpack.c.bf16 %v55_v3, %v54_v2  ;;  %v57_v6 = vld [vmem:[#allocation3 + $0x18] sm:$0xff]  ;;  %v58_v7 = vld [vmem:[#allocation3 + $0x20] sm:$0xff]  ;;  %v59_v8 = vld [vmem:[#allocation3 + $0x28] sm:$0xff] }
  0x2b   :  { %817 = vmatprep.subr.bf16.mxu0 %v921_v1  ;;  %v71_v9 = vpack.c.bf16 %v57_v6, %v56_v5  ;;  %v72_v10 = vpack.c.bf16 %v59_v8, %v58_v7  ;;  %v240_v11 = vld [vmem:[%s1327_s3 + $0x8] sm:$0xff]  ;;  %v242_v12 = vld [vmem:[%s1327_s3 + $0x18] sm:$0xff]  ;;  %v239_v14 = vld [vmem:[%s1327_s3] sm:$0xff] }
  0x2c   :  { %819 = vmatprep.mubr.msk.bf16.mxu0 %vm101_vm0, %v70_v4  ;;  %v835_v13 = vpack.c.bf16 %v242_v12, %v240_v11  ;;  %v241_v15 = vld [vmem:[%s1327_s3 + $0x10] sm:$0xff]  ;;  %v244_v16 = vld [vmem:[%s1327_s3 + $0x28] sm:$0xff]  ;;  %v246_v18 = vld [vmem:[%s1327_s3 + $0x38] sm:$0xff] }
  0x2d   :  { %v837_v17 = vpack.c.bf16 %v241_v15, %v239_v14  ;;  %v243_v19 = vld [vmem:[%s1327_s3 + $0x20] sm:$0xff]  ;;  %v245_v20 = vld [vmem:[%s1327_s3 + $0x30] sm:$0xff]  ;;  %v839_v21 = vpack.c.bf16 %v246_v18, %v244_v16  ;;  %v248_v22 = vld [vmem:[%s1327_s3 + $0x48] sm:$0xff] }
  0x2e   :  { %818 = vmatpush3.bf16.msra.mxu0 %v921_v1  ;;  %836 = vmatprep.subr.bf16.mxu1 %v835_v13  ;;  %v250_v23 = vld [vmem:[%s1327_s3 + $0x58] sm:$0xff]  ;;  %v60_v24 = vld [vmem:[#allocation3 + $0x30] sm:$0xff]  ;;  %v62_v26 = vld [vmem:[#allocation3 + $0x40] sm:$0xff]  ;;  %v841_v27 = vpack.c.bf16 %v245_v20, %v243_v19 }
  0x2f   :  { %v61_v25 = vld [vmem:[#allocation3 + $0x38] sm:$0xff]  ;;  %838 = vmatpush1.bf16.msra.mxu1 %v837_v17  ;;  %v63_v28 = vld [vmem:[#allocation3 + $0x48] sm:$0xff]  ;;  %v843_v29 = vpack.c.bf16 %v250_v23, %v248_v22  ;;  %v247_v30 = vld [vmem:[%s1327_s3 + $0x40] sm:$0xff] }
  0x30   :  { %840 = vmatprep.subr.bf16.mxu1 %v839_v21  ;;  %v249_v31 = vld [vmem:[%s1327_s3 + $0x50] sm:$0xff]  ;;  %v252_v32 = vld [vmem:[%s1327_s3 + $0x68] sm:$0xff]  ;;  %v254_v33 = vld [vmem:[%s1327_s3 + $0x78] sm:$0xff]  ;;  %v73_v34 = vpack.c.bf16 %v61_v25, %v60_v24  ;;  %v74_v35 = vpack.c.bf16 %v63_v28, %v62_v26 }
  0x31   :  { %820 = vmatmul.mubr.msk.bf16.vlgmr.msra.gmra.mrb[0].mxu0 %vm101_vm0, %v71_v9  ;;  %v845_v36 = vpack.c.bf16 %v249_v31, %v247_v30  ;;  %v847_v37 = vpack.c.bf16 %v254_v33, %v252_v32  ;;  %v251_v38 = vld [vmem:[%s1327_s3 + $0x60] sm:$0xff]  ;;  %v253_v39 = vld [vmem:[%s1327_s3 + $0x70] sm:$0xff]  ;;  %v256_v40 = vld [vmem:[%s1327_s3 + $0x88] sm:$0xff] }
  0x32   :  { %823 = vmatprep.mubr.msk.bf16.mxu0 %vm101_vm0, %v72_v10  ;;  %v258_v41 = vld [vmem:[%s1327_s3 + $0x98] sm:$0xff]  ;;  %v64_v42 = vld [vmem:[#allocation3 + $0x50] sm:$0xff]  ;;  %v66_v44 = vld [vmem:[#allocation3 + $0x60] sm:$0xff]  ;;  %v849_v45 = vpack.c.bf16 %v253_v39, %v251_v38  ;;  %v974_v10 = vmov 0.0  }
  0x33   :  { %842 = vmatpush1.bf16.msra.mxu1 %v841_v27  ;;  %v65_v43 = vld [vmem:[#allocation3 + $0x58] sm:$0xff]  ;;  %v67_v46 = vld [vmem:[#allocation3 + $0x68] sm:$0xff]  ;;  %v851_v47 = vpack.c.bf16 %v258_v41, %v256_v40  ;;  %v255_v48 = vld [vmem:[%s1327_s3 + $0x80] sm:$0xff]  ;;  %347 = vmatprep.mubr.f32.mxu1 %v974_v10 }
  0x34   :  { %844 = vmatprep.subr.bf16.mxu1 %v843_v29  ;;  %v257_v49 = vld [vmem:[%s1327_s3 + $0x90] sm:$0xff]  ;;  %v260_v50 = vld [vmem:[%s1327_s3 + $0xa8] sm:$0xff]  ;;  %v262_v51 = vld [vmem:[%s1327_s3 + $0xb8] sm:$0xff]  ;;  %v75_v52 = vpack.c.bf16 %v65_v43, %v64_v42  ;;  %v76_v53 = vpack.c.bf16 %v67_v46, %v66_v44 }
  0x35   :  { %v853_v54 = vpack.c.bf16 %v257_v49, %v255_v48  ;;  %v855_v55 = vpack.c.bf16 %v262_v51, %v260_v50  ;;  %v259_v56 = vld [vmem:[%s1327_s3 + $0xa0] sm:$0xff]  ;;  %v261_v57 = vld [vmem:[%s1327_s3 + $0xb0] sm:$0xff]  ;;  %v264_v58 = vld [vmem:[%s1327_s3 + $0xc8] sm:$0xff] }
  0x36   :  { %v266_v59 = vld [vmem:[%s1327_s3 + $0xd8] sm:$0xff]  ;;  %v68_v60 = vld [vmem:[#allocation3 + $0x70] sm:$0xff]  ;;  %v857_v62 = vpack.c.bf16 %v261_v57, %v259_v56  ;;  %v263_v0 = vld [vmem:[%s1327_s3 + $0xc0] sm:$0xff] }
  0x37   :  { %846 = vmatpush1.bf16.msra.mxu1 %v845_v36  ;;  %v69_v61 = vld [vmem:[#allocation3 + $0x78] sm:$0xff]  ;;  %v859_v63 = vpack.c.bf16 %v266_v59, %v264_v58  ;;  %v265_v1 = vld [vmem:[%s1327_s3 + $0xd0] sm:$0xff]  ;;  %v268_v4 = vld [vmem:[%s1327_s3 + $0xe8] sm:$0xff] }
  0x38   :  { %848 = vmatprep.subr.bf16.mxu1 %v847_v37  ;;  %v77_v2 = vpack.c.bf16 %v69_v61, %v68_v60  ;;  %v861_v3 = vpack.c.bf16 %v265_v1, %v263_v0  ;;  %v270_v5 = vld [vmem:[%s1327_s3 + $0xf8] sm:$0xff]  ;;  %v267_v7 = vld [vmem:[%s1327_s3 + $0xe0] sm:$0xff]  ;;  %v269_v8 = vld [vmem:[%s1327_s3 + $0xf0] sm:$0xff] }
  0x39   :  { %824 = vmatmul.mubr.msk.bf16.gmra.mrb[4].mxu0 %vm101_vm0, %v73_v34  ;;  %v863_v6 = vpack.c.bf16 %v270_v5, %v268_v4  ;;  %v865_v9 = vpack.c.bf16 %v269_v8, %v267_v7  ;;  %v492_v11 = vld [vmem:[%s1329_s5 + $0x80] sm:$0xff]  ;;  %v493_v12 = vld [vmem:[%s1329_s5 + $0x88] sm:$0xff]  ;;  %v494_v16 = vld [vmem:[%s1329_s5 + $0x90] sm:$0xff] }
  0x3a   :  { %827 = vmatprep.mubr.msk.bf16.mxu0 %vm101_vm0, %v74_v35  ;;  %v476_v13 = vld [vmem:[%s1329_s5] sm:$0xff]  ;;  %v867_v14 = vpack.c.bf16 %v493_v12, %v492_v11  ;;  %v477_v15 = vld [vmem:[%s1329_s5 + $0x8] sm:$0xff]  ;;  %v495_v17 = vld [vmem:[%s1329_s5 + $0x98] sm:$0xff] }
  0x3b   :  { %850 = vmatpush1.bf16.msra.mxu1 %v849_v45  ;;  %v869_v18 = vpack.c.bf16 %v477_v15, %v476_v13  ;;  %v871_v19 = vpack.c.bf16 %v495_v17, %v494_v16  ;;  %v478_v20 = vld [vmem:[%s1329_s5 + $0x10] sm:$0xff]  ;;  %v479_v21 = vld [vmem:[%s1329_s5 + $0x18] sm:$0xff]  ;;  %v496_v22 = vld [vmem:[%s1329_s5 + $0xa0] sm:$0xff] }
  0x3c   :  { %852 = vmatprep.subr.bf16.mxu1 %v851_v47  ;;  %868 = vmatprep.subr.bf16.mxu0 %v867_v14  ;;  %v497_v23 = vld [vmem:[%s1329_s5 + $0xa8] sm:$0xff]  ;;  %v873_v24 = vpack.c.bf16 %v479_v21, %v478_v20  ;;  %v480_v26 = vld [vmem:[%s1329_s5 + $0x20] sm:$0xff]  ;;  %v498_v28 = vld [vmem:[%s1329_s5 + $0xb0] sm:$0xff] }
  0x3d   :  { %870 = vmatpush3.bf16.msra.mxu0 %v869_v18  ;;  %v875_v25 = vpack.c.bf16 %v497_v23, %v496_v22  ;;  %v481_v27 = vld [vmem:[%s1329_s5 + $0x28] sm:$0xff]  ;;  %v499_v29 = vld [vmem:[%s1329_s5 + $0xb8] sm:$0xff]  ;;  %v482_v32 = vld [vmem:[%s1329_s5 + $0x30] sm:$0xff] }
  0x3e   :  { %872 = vmatprep.subr.bf16.mxu0 %v871_v19  ;;  %v877_v30 = vpack.c.bf16 %v481_v27, %v480_v26  ;;  %v879_v31 = vpack.c.bf16 %v499_v29, %v498_v28  ;;  %v483_v33 = vld [vmem:[%s1329_s5 + $0x38] sm:$0xff]  ;;  %v500_v34 = vld [vmem:[%s1329_s5 + $0xc0] sm:$0xff]  ;;  %v501_v35 = vld [vmem:[%s1329_s5 + $0xc8] sm:$0xff] }
  0x3f   :  { %854 = vmatpush1.bf16.msra.mxu1 %v853_v54  ;;  %v881_v36 = vpack.c.bf16 %v483_v33, %v482_v32  ;;  %v883_v37 = vpack.c.bf16 %v501_v35, %v500_v34  ;;  %v484_v38 = vld [vmem:[%s1329_s5 + $0x40] sm:$0xff]  ;;  %v485_v39 = vld [vmem:[%s1329_s5 + $0x48] sm:$0xff]  ;;  %v502_v40 = vld [vmem:[%s1329_s5 + $0xd0] sm:$0xff] }
  0x40   :  { %856 = vmatprep.subr.bf16.mxu1 %v855_v55  ;;  %v503_v41 = vld [vmem:[%s1329_s5 + $0xd8] sm:$0xff]  ;;  %v885_v42 = vpack.c.bf16 %v485_v39, %v484_v38  ;;  %v486_v44 = vld [vmem:[%s1329_s5 + $0x50] sm:$0xff]  ;;  %v504_v46 = vld [vmem:[%s1329_s5 + $0xe0] sm:$0xff] }
  0x41   :  { %828 = vmatmul.mubr.msk.bf16.gmra.mrb[8].mxu0 %vm101_vm0, %v75_v52  ;;  %v887_v43 = vpack.c.bf16 %v503_v41, %v502_v40  ;;  %v487_v45 = vld [vmem:[%s1329_s5 + $0x58] sm:$0xff]  ;;  %v505_v47 = vld [vmem:[%s1329_s5 + $0xe8] sm:$0xff]  ;;  %v1228_v50 = vld [vmem:[#allocation5] ss:$0 sm:$0xff] }
  0x42   :  { %831 = vmatprep.mubr.msk.bf16.mxu0 %vm101_vm0, %v76_v53  ;;  %874 = vmatpush3.bf16.msra.mxu0 %v873_v24  ;;  %v889_v48 = vpack.c.bf16 %v487_v45, %v486_v44  ;;  %v891_v49 = vpack.c.bf16 %v505_v47, %v504_v46  ;;  %v506_v39 = vld [vmem:[%s1329_s5 + $0xf0] sm:$0xff]  ;;  %v273_v44 = vlaneseq  ;;  %v271_v47 = vld [vmem:[%s1328_s4] sm:$0x3] }
  0x43   :  { %858 = vmatpush1.bf16.msra.mxu1 %v857_v62  ;;  %876 = vmatprep.subr.bf16.mxu0 %v875_v25  ;;  %v490_v41 = vld [vmem:[%s1329_s5 + $0x70] sm:$0xff] }
  0x44   :  { %860 = vmatprep.subr.bf16.mxu1 %v859_v63  ;;  %v274_v45 = vshrl.u32 %v273_v44, 7 }
  0x46   :  { %878 = vmatpush3.bf16.msra.mxu0 %v877_v30  ;;  %v275_v46 = vsub.s32 0, %v274_v45 }
  0x47   :  { %862 = vmatpush1.bf16.msra.mxu1 %v861_v3  ;;  %880 = vmatprep.subr.bf16.mxu0 %v879_v31 }
  0x48   :  { %864 = vmatprep.subr.bf16.mxu1 %v863_v6 }
  0x49   :  { %832 = vmatmul.mubr.msk.bf16.gmra.mrb[12].mxu0 %vm101_vm0, %v77_v2 }
  0x4a   :  { %882 = vmatpush3.bf16.msra.mxu0 %v881_v36 }
  0x4b   :  { %866 = vmatpush1.bf16.msra.mxu1 %v865_v9  ;;  %884 = vmatprep.subr.bf16.mxu0 %v883_v37 }
  0x4c   :  { %899 = vmatprep.subr.bf16.mxu1 %v867_v14 }
  0x4e   :  { %886 = vmatpush3.bf16.msra.mxu0 %v885_v42 }
  0x4f   :  { %888 = vmatprep.subr.bf16.mxu0 %v887_v43 }
  0x52   :  { %890 = vmatpush3.bf16.msra.mxu0 %v889_v48 }
  0x53   :  { %892 = vmatprep.subr.bf16.mxu0 %v891_v49 }
 0x104   :  { %v821_v51 = vpop.f32.mrb[0].mxu0 }
 0x105   :  { %v160_v52 = vpop.f32.mrb[1].mxu0  ;;  %v169_v58 = vadd.f32 %v821_v51, %v1228_v50 }
 0x106   :  { %v161_v53 = vadd.f32 %v1228_v50, %v160_v52  ;;  %v822_v54 = vpop.f32.mrb[2].mxu0 }
 0x107   :  { %v163_v55 = vpop.f32.mrb[3].mxu0  ;;  %v225_v0 = vmax.f32 %v169_v58, 0.0  ;;  %v172_v1 = vadd.f32 %v822_v54, %v1228_v50 }
 0x108   :  { %v223_v56 = vmax.f32 %v161_v53, 0.0  ;;  %v164_v57 = vadd.f32 %v1228_v50, %v163_v55 }
 0x109   :  { %v226_v3 = vmax.f32 %v172_v1, 0.0 }
 0x10a   :  { %348 = vmatmul.mubr.f32.vlgmr.msra.gmra.mrb[0].mxu1 %v223_v56  ;;  %v224_v59 = vmax.f32 %v164_v57, 0.0 }
 0x10b   :  { %353 = vmatprep.mubr.f32.mxu1 %v974_v10  ;;  %907 = vmatpush3.bf16.msra.mxu1 %v869_v18 }
 0x10c   :  { %v825_v60 = vpop.f32.mrb[4].mxu0  ;;  %900 = vmatprep.subr.bf16.mxu1 %v871_v19 }
 0x10d   :  { %v176_v61 = vpop.f32.mrb[5].mxu0  ;;  %v185_v11 = vadd.f32 %v825_v60, %v1228_v50 }
 0x10e   :  { %354 = vmatmul.mubr.f32.gmra.mrb[2].mxu1 %v224_v59  ;;  %v826_v62 = vpop.f32.mrb[6].mxu0  ;;  %v177_v2 = vadd.f32 %v1228_v50, %v176_v61 }
 0x10f   :  { %359 = vmatprep.mubr.f32.mxu1 %v974_v10  ;;  %v179_v63 = vpop.f32.mrb[7].mxu0  ;;  %908 = vmatpush3.bf16.msra.mxu1 %v873_v24  ;;  %v229_v17 = vmax.f32 %v185_v11, 0.0  ;;  %v188_v18 = vadd.f32 %v826_v62, %v1228_v50 }
 0x110   :  { %901 = vmatprep.subr.bf16.mxu1 %v875_v25  ;;  %v227_v6 = vmax.f32 %v177_v2, 0.0  ;;  %v180_v9 = vadd.f32 %v1228_v50, %v179_v63 }
 0x111   :  { %v230_v20 = vmax.f32 %v188_v18, 0.0 }
 0x112   :  { %360 = vmatmul.mubr.f32.gmra.mrb[4].mxu1 %v225_v0  ;;  %v228_v12 = vmax.f32 %v180_v9, 0.0 }
 0x113   :  { %365 = vmatprep.mubr.f32.mxu1 %v974_v10  ;;  %909 = vmatpush3.bf16.msra.mxu1 %v877_v30 }
 0x114   :  { %v829_v4 = vpop.f32.mrb[8].mxu0  ;;  %902 = vmatprep.subr.bf16.mxu1 %v879_v31 }
 0x115   :  { %v192_v5 = vpop.f32.mrb[9].mxu0  ;;  %v201_v23 = vadd.f32 %v829_v4, %v1228_v50 }
 0x116   :  { %366 = vmatmul.mubr.f32.gmra.mrb[6].mxu1 %v226_v3  ;;  %v830_v7 = vpop.f32.mrb[10].mxu0  ;;  %v193_v19 = vadd.f32 %v1228_v50, %v192_v5 }
 0x117   :  { %371 = vmatprep.mubr.f32.mxu1 %v974_v10  ;;  %v195_v8 = vpop.f32.mrb[11].mxu0  ;;  %910 = vmatpush3.bf16.msra.mxu1 %v881_v36  ;;  %v233_v25 = vmax.f32 %v201_v23, 0.0  ;;  %v204_v26 = vadd.f32 %v830_v7, %v1228_v50  ;;  %v488_v36 = vld [vmem:[%s1329_s5 + $0x60] sm:$0xff] }
 0x118   :  { %903 = vmatprep.subr.bf16.mxu1 %v883_v37  ;;  %v231_v21 = vmax.f32 %v193_v19, 0.0  ;;  %v196_v22 = vadd.f32 %v1228_v50, %v195_v8  ;;  %v489_v37 = vld [vmem:[%s1329_s5 + $0x68] sm:$0xff] }
 0x119   :  { %v234_v28 = vmax.f32 %v204_v26, 0.0  ;;  %v893_v38 = vpack.c.bf16 %v489_v37, %v488_v36 }
 0x11a   :  { %372 = vmatmul.mubr.f32.gmra.mrb[8].mxu1 %v227_v6  ;;  %v232_v24 = vmax.f32 %v196_v22, 0.0 }
 0x11b   :  { %377 = vmatprep.mubr.f32.mxu1 %v974_v10  ;;  %911 = vmatpush3.bf16.msra.mxu1 %v885_v42  ;;  %v491_v42 = vld [vmem:[%s1329_s5 + $0x78] sm:$0xff] }
 0x11c   :  { %v833_v13 = vpop.f32.mrb[12].mxu0  ;;  %904 = vmatprep.subr.bf16.mxu1 %v887_v43  ;;  %894 = vmatpush3.bf16.msra.mxu0 %v893_v38  ;;  %v897_v43 = vpack.c.bf16 %v491_v42, %v490_v41 }
 0x11d   :  { %v208_v14 = vpop.f32.mrb[13].mxu0  ;;  %v217_v31 = vadd.f32 %v833_v13, %v1228_v50 }
 0x11e   :  { %378 = vmatmul.mubr.f32.gmra.mrb[10].mxu1 %v228_v12  ;;  %v834_v15 = vpop.f32.mrb[14].mxu0  ;;  %v209_v27 = vadd.f32 %v1228_v50, %v208_v14 }
 0x11f   :  { %383 = vmatprep.mubr.f32.mxu1 %v974_v10  ;;  %v211_v16 = vpop.f32.mrb[15].mxu0  ;;  %912 = vmatpush3.bf16.msra.mxu1 %v889_v48  ;;  %v237_v33 = vmax.f32 %v217_v31, 0.0  ;;  %v220_v34 = vadd.f32 %v834_v15, %v1228_v50  ;;  %v279_v48 = vsub.s32 1, %v274_v45 }
 0x120   :  { %905 = vmatprep.subr.bf16.mxu1 %v891_v49  ;;  %v235_v29 = vmax.f32 %v209_v27, 0.0  ;;  %v212_v30 = vadd.f32 %v1228_v50, %v211_v16  ;;  %v1282_v49 = vrot.slane %v271_v47, %v275_v46 }
 0x121   :  { %v238_v35 = vmax.f32 %v220_v34, 0.0  ;;  %v1284_v50 = vrot.slane %v271_v47, %v279_v48 }
 0x122   :  { %384 = vmatmul.mubr.f32.gmra.mrb[12].mxu1 %v229_v17  ;;  %v236_v32 = vmax.f32 %v212_v30, 0.0 }
 0x123   :  { %389 = vmatprep.mubr.f32.mxu1 %v974_v10  ;;  %913 = vmatpush3.bf16.msra.mxu1 %v893_v38 }
 0x126   :  { %390 = vmatmul.mubr.f32.gmra.mrb[14].mxu1 %v230_v20 }
 0x127   :  { %395 = vmatprep.mubr.f32.mxu1 %v974_v10 }
 0x12a   :  { %396 = vmatmul.mubr.f32.gmra.mrb[16].mxu1 %v231_v21 }
 0x12b   :  { %401 = vmatprep.mubr.f32.mxu1 %v974_v10 }
 0x12e   :  { %402 = vmatmul.mubr.f32.gmra.mrb[18].mxu1 %v232_v24 }
 0x12f   :  { %407 = vmatprep.mubr.f32.mxu1 %v974_v10 }
 0x132   :  { %408 = vmatmul.mubr.f32.gmra.mrb[20].mxu1 %v233_v25 }
 0x133   :  { %413 = vmatprep.mubr.f32.mxu1 %v974_v10 }
 0x136   :  { %414 = vmatmul.mubr.f32.gmra.mrb[22].mxu1 %v234_v28 }
 0x137   :  { %419 = vmatprep.mubr.f32.mxu1 %v974_v10 }
 0x13a   :  { %420 = vmatmul.mubr.f32.gmra.mrb[24].mxu1 %v235_v29 }
 0x13b   :  { %425 = vmatprep.mubr.f32.mxu1 %v974_v10 }
 0x13e   :  { %426 = vmatmul.mubr.f32.gmra.mrb[26].mxu1 %v236_v32 }
 0x13f   :  { %431 = vmatprep.mubr.f32.mxu1 %v974_v10 }
 0x142   :  { %432 = vmatmul.mubr.f32.gmra.mrb[28].mxu1 %v237_v33 }
 0x143   :  { %437 = vmatprep.mubr.f32.mxu1 %v974_v10  ;;  %v507_v10 = vld [vmem:[%s1329_s5 + $0xf8] sm:$0xff] }
 0x144   :  { %v895_v40 = vpack.c.bf16 %v507_v10, %v506_v39 }
 0x146   :  { %438 = vmatmul.mubr.f32.gmra.mrb[30].mxu1 %v238_v35  ;;  %896 = vmatprep.subr.bf16.mxu0 %v895_v40 }
 0x147   :  { %906 = vmatprep.subr.bf16.mxu1 %v895_v40  ;;  %898 = vmatpush3.bf16.msra.mxu0 %v897_v43 }
 0x148   :  { %914 = vmatpush3.bf16.msra.mxu1 %v897_v43 }
 0x1dd   :  { %v349_v51 = vpop.f32.mrb[0].mxu1 }
 0x1de   :  { %v350_v52 = vadd.f32 %v349_v51, %v1282_v49  ;;  %v351_v53 = vpop.f32.mrb[1].mxu1 }
 0x1df   :  { %v352_v54 = vadd.f32 %v351_v53, %v1284_v50 }
 0x1e0   :  { %v444_v57 = vmax.f32 %v350_v52, 0.0 }
 0x1e1   :  { %v445_v55 = vmax.f32 %v352_v54, 0.0  ;;  %v355_v56 = vpop.f32.mrb[2].mxu1 }
 0x1e2   :  { %v356_v58 = vadd.f32 %v355_v56, %v1282_v49  ;;  %v357_v59 = vpop.f32.mrb[3].mxu1 }
 0x1e3   :  { %v358_v60 = vadd.f32 %v357_v59, %v1284_v50  ;;  %574 = vmatprep.mubr.f32.mxu0 %v445_v55 }
 0x1e4   :  { %575 = vmatmul.mubr.f32.vlgmr.msra.gmra.mrb[16].mxu0 %v444_v57  ;;  %v446_v63 = vmax.f32 %v356_v58, 0.0 }
 0x1e5   :  { %v447_v61 = vmax.f32 %v358_v60, 0.0  ;;  %v361_v62 = vpop.f32.mrb[4].mxu1 }
 0x1e6   :  { %v362_v0 = vadd.f32 %v361_v62, %v1282_v49  ;;  %v363_v1 = vpop.f32.mrb[5].mxu1 }
 0x1e7   :  { %v364_v2 = vadd.f32 %v363_v1, %v1284_v50  ;;  %579 = vmatprep.mubr.f32.mxu0 %v447_v61 }
 0x1e8   :  { %580 = vmatmul.mubr.f32.gmra.mrb[18].mxu0 %v446_v63  ;;  %v448_v5 = vmax.f32 %v362_v0, 0.0 }
 0x1e9   :  { %v449_v3 = vmax.f32 %v364_v2, 0.0  ;;  %v367_v4 = vpop.f32.mrb[6].mxu1 }
 0x1ea   :  { %v368_v6 = vadd.f32 %v367_v4, %v1282_v49  ;;  %v369_v7 = vpop.f32.mrb[7].mxu1 }
 0x1eb   :  { %v370_v8 = vadd.f32 %v369_v7, %v1284_v50  ;;  %584 = vmatprep.mubr.f32.mxu0 %v449_v3 }
 0x1ec   :  { %585 = vmatmul.mubr.f32.gmra.mrb[20].mxu0 %v448_v5  ;;  %v450_v12 = vmax.f32 %v368_v6, 0.0 }
 0x1ed   :  { %v451_v9 = vmax.f32 %v370_v8, 0.0  ;;  %v373_v11 = vpop.f32.mrb[8].mxu1 }
 0x1ee   :  { %v374_v13 = vadd.f32 %v373_v11, %v1282_v49  ;;  %v375_v14 = vpop.f32.mrb[9].mxu1 }
 0x1ef   :  { %v376_v15 = vadd.f32 %v375_v14, %v1284_v50  ;;  %589 = vmatprep.mubr.f32.mxu0 %v451_v9 }
 0x1f0   :  { %590 = vmatmul.mubr.f32.gmra.mrb[22].mxu0 %v450_v12  ;;  %v452_v18 = vmax.f32 %v374_v13, 0.0 }
 0x1f1   :  { %v453_v16 = vmax.f32 %v376_v15, 0.0  ;;  %v379_v17 = vpop.f32.mrb[10].mxu1 }
 0x1f2   :  { %v380_v19 = vadd.f32 %v379_v17, %v1282_v49  ;;  %v381_v20 = vpop.f32.mrb[11].mxu1 }
 0x1f3   :  { %v382_v21 = vadd.f32 %v381_v20, %v1284_v50  ;;  %594 = vmatprep.mubr.f32.mxu0 %v453_v16 }
 0x1f4   :  { %595 = vmatmul.mubr.f32.gmra.mrb[24].mxu0 %v452_v18  ;;  %v454_v24 = vmax.f32 %v380_v19, 0.0 }
 0x1f5   :  { %v455_v22 = vmax.f32 %v382_v21, 0.0  ;;  %v385_v23 = vpop.f32.mrb[12].mxu1 }
 0x1f6   :  { %v386_v25 = vadd.f32 %v385_v23, %v1282_v49  ;;  %v387_v26 = vpop.f32.mrb[13].mxu1  ;;  %v509_v23 = vstv %s1330_s6 }
 0x1f7   :  { %v388_v27 = vadd.f32 %v387_v26, %v1284_v50  ;;  %599 = vmatprep.mubr.f32.mxu0 %v455_v22 }
 0x1f8   :  { %600 = vmatmul.mubr.f32.gmra.mrb[26].mxu0 %v454_v24  ;;  %v456_v30 = vmax.f32 %v386_v25, 0.0 }
 0x1f9   :  { %v457_v28 = vmax.f32 %v388_v27, 0.0  ;;  %v391_v29 = vpop.f32.mrb[14].mxu1 }
 0x1fa   :  { %v392_v31 = vadd.f32 %v391_v29, %v1282_v49  ;;  %v393_v32 = vpop.f32.mrb[15].mxu1 }
 0x1fb   :  { %v394_v33 = vadd.f32 %v393_v32, %v1284_v50  ;;  %604 = vmatprep.mubr.f32.mxu0 %v457_v28 }
 0x1fc   :  { %605 = vmatmul.mubr.f32.gmra.mrb[28].mxu0 %v456_v30  ;;  %v458_v36 = vmax.f32 %v392_v31, 0.0 }
 0x1fd   :  { %v459_v34 = vmax.f32 %v394_v33, 0.0  ;;  %v397_v35 = vpop.f32.mrb[16].mxu1 }
 0x1fe   :  { %v398_v37 = vadd.f32 %v397_v35, %v1282_v49  ;;  %v399_v38 = vpop.f32.mrb[17].mxu1 }
 0x1ff   :  { %v400_v39 = vadd.f32 %v399_v38, %v1284_v50  ;;  %609 = vmatprep.mubr.f32.mxu0 %v459_v34 }
 0x200   :  { %610 = vmatmul.mubr.f32.gmra.mrb[30].mxu0 %v458_v36  ;;  %v460_v41 = vmax.f32 %v398_v37, 0.0 }
 0x201   :  { %v461_v10 = vmax.f32 %v400_v39, 0.0  ;;  %v403_v40 = vpop.f32.mrb[18].mxu1 }
 0x202   :  { %v404_v42 = vadd.f32 %v403_v40, %v1282_v49  ;;  %v405_v43 = vpop.f32.mrb[19].mxu1 }
 0x203   :  { %v406_v44 = vadd.f32 %v405_v43, %v1284_v50  ;;  %614 = vmatprep.mubr.f32.mxu0 %v461_v10 }
 0x204   :  { %615 = vmatmul.mubr.f32.gmra.mrb[32].mxu0 %v460_v41  ;;  %v462_v47 = vmax.f32 %v404_v42, 0.0 }
 0x205   :  { %v463_v45 = vmax.f32 %v406_v44, 0.0  ;;  %v409_v46 = vpop.f32.mrb[20].mxu1 }
 0x206   :  { %v410_v48 = vadd.f32 %v409_v46, %v1282_v49  ;;  %v411_v51 = vpop.f32.mrb[21].mxu1 }
 0x207   :  { %v412_v52 = vadd.f32 %v411_v51, %v1284_v50  ;;  %619 = vmatprep.mubr.f32.mxu0 %v463_v45 }
 0x208   :  { %620 = vmatmul.mubr.f32.gmra.mrb[34].mxu0 %v462_v47  ;;  %v464_v55 = vmax.f32 %v410_v48, 0.0 }
 0x209   :  { %v465_v53 = vmax.f32 %v412_v52, 0.0  ;;  %v415_v54 = vpop.f32.mrb[22].mxu1 }
 0x20a   :  { %v416_v56 = vadd.f32 %v415_v54, %v1282_v49  ;;  %v417_v57 = vpop.f32.mrb[23].mxu1 }
 0x20b   :  { %v418_v58 = vadd.f32 %v417_v57, %v1284_v50  ;;  %624 = vmatprep.mubr.f32.mxu0 %v465_v53 }
 0x20c   :  { %625 = vmatmul.mubr.f32.gmra.mrb[36].mxu0 %v464_v55  ;;  %v466_v61 = vmax.f32 %v416_v56, 0.0 }
 0x20d   :  { %v467_v59 = vmax.f32 %v418_v58, 0.0  ;;  %v421_v60 = vpop.f32.mrb[24].mxu1 }
 0x20e   :  { %v422_v62 = vadd.f32 %v421_v60, %v1282_v49  ;;  %v423_v63 = vpop.f32.mrb[25].mxu1 }
 0x20f   :  { %v424_v0 = vadd.f32 %v423_v63, %v1284_v50  ;;  %629 = vmatprep.mubr.f32.mxu0 %v467_v59 }
 0x210   :  { %630 = vmatmul.mubr.f32.gmra.mrb[38].mxu0 %v466_v61  ;;  %v468_v3 = vmax.f32 %v422_v62, 0.0 }
 0x211   :  { %v469_v1 = vmax.f32 %v424_v0, 0.0  ;;  %v427_v2 = vpop.f32.mrb[26].mxu1 }
 0x212   :  { %v428_v4 = vadd.f32 %v427_v2, %v1282_v49  ;;  %v429_v5 = vpop.f32.mrb[27].mxu1 }
 0x213   :  { %v430_v6 = vadd.f32 %v429_v5, %v1284_v50  ;;  %634 = vmatprep.mubr.f32.mxu0 %v469_v1 }
 0x214   :  { %635 = vmatmul.mubr.f32.gmra.mrb[40].mxu0 %v468_v3  ;;  %v470_v9 = vmax.f32 %v428_v4, 0.0 }
 0x215   :  { %v471_v7 = vmax.f32 %v430_v6, 0.0  ;;  %v433_v8 = vpop.f32.mrb[28].mxu1 }
 0x216   :  { %v434_v11 = vadd.f32 %v433_v8, %v1282_v49  ;;  %v435_v12 = vpop.f32.mrb[29].mxu1 }
 0x217   :  { %v436_v13 = vadd.f32 %v435_v12, %v1284_v50  ;;  %639 = vmatprep.mubr.f32.mxu0 %v471_v7 }
 0x218   :  { %640 = vmatmul.mubr.f32.gmra.mrb[42].mxu0 %v470_v9  ;;  %v472_v16 = vmax.f32 %v434_v11, 0.0 }
 0x219   :  { %v473_v14 = vmax.f32 %v436_v13, 0.0  ;;  %v439_v15 = vpop.f32.mrb[30].mxu1 }
 0x21a   :  { %v440_v17 = vadd.f32 %v439_v15, %v1282_v49  ;;  %v441_v18 = vpop.f32.mrb[31].mxu1 }
 0x21b   :  { %v442_v19 = vadd.f32 %v441_v18, %v1284_v50  ;;  %644 = vmatprep.mubr.f32.mxu0 %v473_v14 }
 0x21c   :  { %645 = vmatmul.mubr.f32.gmra.mrb[44].mxu0 %v472_v16  ;;  %v474_v21 = vmax.f32 %v440_v17, 0.0 }
 0x21d   :  { %v475_v20 = vmax.f32 %v442_v19, 0.0 }
 0x21f   :  { %649 = vmatprep.mubr.f32.mxu1 %v475_v20 }
 0x220   :  { %650 = vmatmul.mubr.f32.vlgmr.msra.gmra.mrb[32].mxu1 %v474_v21 }
 0x2b7   :  { %v767_v22 = vpop.f32.mrb[16].mxu0 }
 0x2b8   :  { %v768_v24 = vpop.f32.mrb[17].mxu0 }
 0x2b9   :  { %v769_v25 = vadd.f32 %v768_v24, %v767_v22 }
 0x2bb   :  { %v577_v26 = vadd.f32 %v769_v25, %v509_v23  ;;  %v770_v27 = vpop.f32.mrb[18].mxu0 }
 0x2bc   :  { %v771_v49 = vpop.f32.mrb[19].mxu0 }
 0x2bd   :  { %656 = vst.msk [vmem:[#allocation7] sm:$0xff] %vm655_vm1, %v577_v26 }
 0x2bf   :  { %v773_v28 = vpop.f32.mrb[20].mxu0 }
 0x2c0   :  { %v774_v50 = vpop.f32.mrb[21].mxu0 }
 0x2c3   :  { %v776_v29 = vpop.f32.mrb[22].mxu0 }
 0x2c4   :  { %v701_v30 = vld [vmem:[#allocation7] sm:$0xff]  ;;  %v777_v31 = vpop.f32.mrb[23].mxu0 }
 0x2c5   :  { %702 = vst [vmem:[%s1331_s7] sm:$0xff] %v701_v30 }
 0x2c7   :  { %v779_v32 = vpop.f32.mrb[24].mxu0 }
 0x2c8   :  { %v780_v33 = vpop.f32.mrb[25].mxu0 }
 0x2cb   :  { %v782_v34 = vpop.f32.mrb[26].mxu0 }
 0x2cc   :  { %v783_v35 = vpop.f32.mrb[27].mxu0 }
 0x2cf   :  { %v785_v36 = vpop.f32.mrb[28].mxu0 }
 0x2d0   :  { %v786_v37 = vpop.f32.mrb[29].mxu0 }
 0x2d3   :  { %v788_v38 = vpop.f32.mrb[30].mxu0 }
 0x2d4   :  { %v789_v39 = vpop.f32.mrb[31].mxu0 }
 0x2d7   :  { %v791_v10 = vpop.f32.mrb[32].mxu0 }
 0x2d8   :  { %v792_v40 = vpop.f32.mrb[33].mxu0 }
 0x2db   :  { %v794_v41 = vpop.f32.mrb[34].mxu0 }
 0x2dc   :  { %v795_v42 = vpop.f32.mrb[35].mxu0 }
 0x2df   :  { %v797_v43 = vpop.f32.mrb[36].mxu0 }
 0x2e0   :  { %v798_v44 = vpop.f32.mrb[37].mxu0 }
 0x2e3   :  { %v800_v45 = vpop.f32.mrb[38].mxu0 }
 0x2e4   :  { %v801_v46 = vpop.f32.mrb[39].mxu0 }
 0x2e7   :  { %v803_v47 = vpop.f32.mrb[40].mxu0 }
 0x2e8   :  { %v804_v48 = vpop.f32.mrb[41].mxu0 }
 0x2eb   :  { %v806_v51 = vpop.f32.mrb[42].mxu0 }
 0x2ec   :  { %v807_v52 = vpop.f32.mrb[43].mxu0 }
 0x2ef   :  { %v809_v53 = vpop.f32.mrb[44].mxu0 }
 0x2f0   :  { %v810_v54 = vpop.f32.mrb[45].mxu0 }
 0x2f3   :  { %v812_v55 = vpop.f32.mrb[32].mxu1 }
 0x2f4   :  { %v813_v56 = vpop.f32.mrb[33].mxu1 }
 0x2f5   :  { %708 = vsyncpa [#allocation4], 1 }
 0x2f6   :  { %709 = vsyncpa [#allocation6], 1 }

</bundles_post_ra>
